<compile_context>
chip_gen: v5e
topology: v5e:2x2
jax: 0.10.0
libtpu: 0.0.40
codegen_flags: <defaults>
</compile_context>

<pallas_src>
import functools

import jax
import jax.numpy as jnp
from jax import lax
from jax.experimental import pallas as pl
from jax.experimental.pallas import tpu as pltpu


def _round_up(a, b):
    return (a + b - 1) // b * b


def _vmem_capacity_bytes():
    """Generation-aware VMEM size (v5e/v6e: 128 MiB, v7x: 64 MiB per core)."""
    try:
        return int(pltpu.get_tpu_info().vmem_capacity_bytes)
    except Exception:
        return 64 << 20          # conservative (v7x-sized) fallback


# --------------------------------------------------------------------------
# Pass 1: conv tile (bf16 MXU, f32 accumulate) + per-tile partial statistics.
# Every output block is written exactly once per grid step => grid axis is
# "parallel" (both v7x TensorCores can run it).
# --------------------------------------------------------------------------
def _conv_stats_kernel(x_ref, w_ref, y_ref, sum_ref, sq_ref, *,
                       total_rows, tile_rows):
    i = pl.program_id(0)
    y = jnp.dot(x_ref[...], w_ref[...], preferred_element_type=jnp.float32)
    yb = y.astype(y_ref.dtype)            # y stored as bf16 (halves HBM traffic)
    y_ref[...] = yb
    yf = yb.astype(jnp.float32)           # stats describe exactly what pass 2 reads

    cout_p = yf.shape[1]
    if total_rows % tile_rows == 0:       # trace-time branch: every row valid
        s = jnp.sum(yf, axis=0, keepdims=True)                      # (1, Cp)
        mu = s * (1.0 / tile_rows)
        c = yf - mu
        m2 = jnp.sum(c * c, axis=0, keepdims=True)                  # (1, Cp)
    else:                                 # last tile contains zero-padded rows
        valid = jnp.minimum(total_rows - i * tile_rows, tile_rows)
        row = lax.broadcasted_iota(jnp.int32, (tile_rows, 1), 0)
        mask = row < valid
        ym = jnp.where(mask, yf, 0.0)
        s = jnp.sum(ym, axis=0, keepdims=True)
        mu = s / valid.astype(jnp.float32)
        c = jnp.where(mask, yf - mu, 0.0)  # mean-shifted => no cancellation
        m2 = jnp.sum(c * c, axis=0, keepdims=True)

    # Broadcast the (1, Cp) partials over 8 sublanes so the store is a full,
    # unmasked (8, Cp) block (the XLA combine only reads sublane 0).
    sum_ref[0] = jnp.broadcast_to(s, (8, cout_p))
    sq_ref[0] = jnp.broadcast_to(m2, (8, cout_p))


# --------------------------------------------------------------------------
# Pass 2: y * scale + bias, then (Leaky)ReLU.  Fully parallel over rows.
# --------------------------------------------------------------------------
def _bn_act_kernel(y_ref, scale_ref, bias_ref, o_ref, *, neg_slope):
    yn = y_ref[...].astype(jnp.float32) * scale_ref[...] + bias_ref[...]
    o_ref[...] = jnp.where(yn > 0, yn, neg_slope * yn).astype(o_ref.dtype)


def _im2col_k4s2_reflect(x):
    """im2col for Conv2d(k=4, s=2, p=1, padding_mode='reflect'), NCHW input.

    Runs in the input dtype (bf16 from the wrapper) so the 4x-sized patch
    tensor is only materialized once at half width.
    """
    n, cin, h, w = x.shape
    hout, wout = h // 2, w // 2
    xp = jnp.pad(x, ((0, 0), (0, 0), (1, 1), (1, 1)), mode="reflect")
    # patches[..., kh*4+kw, oh, ow] = xp[:, :, 2*oh+kh, 2*ow+kw]
    patches = jnp.stack(
        [xp[:, :, dh:dh + 2 * hout:2, dw:dw + 2 * wout:2]
         for dh in range(4) for dw in range(4)],
        axis=2)                                           # (N, Cin, 16, Ho, Wo)
    xcol = jnp.transpose(patches, (0, 3, 4, 1, 2)).reshape(
        n * hout * wout, cin * 16)                        # (M, Cin*16)
    return xcol, (n, hout, wout)


@functools.partial(jax.jit, static_argnames=("act", "eps", "tm"))
def block_forward(x, conv_w, gamma, beta, *, act="relu", eps=1e-5, tm=None):
    """x: (N, C_in, H, W) float32 NCHW; conv_w: (C_out, C_in, 4, 4)."""
    cout, cin = conv_w.shape[0], conv_w.shape[1]

    # ---- im2col in bf16 (no extra f32 copy of the largest intermediate) ----
    xcol, (n, hout, wout) = _im2col_k4s2_reflect(x.astype(jnp.bfloat16))
    m, k = xcol.shape

    cout_p = _round_up(cout, 128)     # lane-dense stores; do NOT pad to 256
    kp = _round_up(k, 128)            # lane-dense im2col loads

    # Weight block: single-buffer when large (index_map is constant, so it is
    # only fetched once either way; single-buffering reclaims VMEM for tiles).
    w_bytes = kp * cout_p * 2
    single_buffer_w = w_bytes >= (4 << 20)
    w_bufs = 1 if single_buffer_w else 2

    # ---- generation-aware row tile / VMEM budget ----
    vmem_cap = _vmem_capacity_bytes()
    ws_cap = max(8 << 20, int(0.55 * vmem_cap))   # per-pass working-set budget

    def _need(t):
        p1 = (2 * t * kp * 2                 # xcol tile, bf16, double-buffered
              + w_bufs * kp * cout_p * 2     # weight block, bf16
              + 2 * t * cout_p * 2           # y tile, bf16, double-buffered
              + 2 * 2 * 8 * cout_p * 4)      # partial-stat blocks, f32
        p2 = (2 * t * cout_p * 2             # y tile in, bf16
              + 2 * t * cout_p * 4           # out tile, f32
              + 4 * cout_p * 4)              # scale / bias
        return max(p1, p2)

    if tm is None:
        tm = min(4096, _round_up(max(m, 8), 8))   # large tiles amortize step cost
    tm = max(8, (tm // 8) * 8)
    while tm > 8 and _need(tm) > ws_cap:
        tm = max(8, (tm // 2 // 8) * 8)

    m_p = _round_up(m, tm)
    n_tiles = m_p // tm
    vmem_limit = int(min(int(0.80 * vmem_cap), max(32 << 20, 2 * _need(tm))))

    # ---- padded bf16 operands (skip the pad entirely when aligned) ----
    xcol_b = xcol if (m_p, kp) == (m, k) else jnp.pad(
        xcol, ((0, m_p - m), (0, kp - k)))
    w_mat = conv_w.reshape(cout, cin * 16).T.astype(jnp.bfloat16)   # (K, Cout)
    w_b = w_mat if (kp, cout_p) == (k, cout) else jnp.pad(
        w_mat, ((0, kp - k), (0, cout_p - cout)))

    if single_buffer_w:
        w_spec = pl.BlockSpec((kp, cout_p), lambda i: (0, 0),
                              pipeline_mode=pl.Buffered(1))
    else:
        w_spec = pl.BlockSpec((kp, cout_p), lambda i: (0, 0))

    # ---- pass 1: conv (bf16 y) + per-tile partial batch statistics ----
    kernel1 = functools.partial(_conv_stats_kernel, total_rows=m, tile_rows=tm)
    y, ssum, ssq = pl.pallas_call(
        kernel1,
        out_shape=(jax.ShapeDtypeStruct((m_p, cout_p), jnp.bfloat16),
                   jax.ShapeDtypeStruct((n_tiles, 8, cout_p), jnp.float32),
                   jax.ShapeDtypeStruct((n_tiles, 8, cout_p), jnp.float32)),
        grid_spec=pltpu.PrefetchScalarGridSpec(
            num_scalar_prefetch=0,
            grid=(n_tiles,),
            in_specs=[pl.BlockSpec((tm, kp), lambda i: (i, 0)), w_spec],
            out_specs=(pl.BlockSpec((tm, cout_p), lambda i: (i, 0)),
                       pl.BlockSpec((1, 8, cout_p), lambda i: (i, 0, 0)),
                       pl.BlockSpec((1, 8, cout_p), lambda i: (i, 0, 0))),
        ),
        compiler_params=pltpu.CompilerParams(
            dimension_semantics=("parallel",),     # per-tile partials: no races
            vmem_limit_bytes=vmem_limit),
    )(xcol_b, w_b)

    # ---- combine per-tile partials (Chan / parallel-Welford, tiny, in XLA) --
    s_part = ssum[:, 0, :]                                   # (n_tiles, Cp)
    m2_part = ssq[:, 0, :]
    cnt = jnp.minimum(m - jnp.arange(n_tiles) * tm, tm).astype(
        jnp.float32)[:, None]
    mu_part = s_part / cnt
    mean = jnp.sum(s_part, axis=0, keepdims=True) / float(m)        # (1, Cp)
    m2_tot = (jnp.sum(m2_part, axis=0, keepdims=True)
              + jnp.sum(cnt * (mu_part - mean) ** 2, axis=0, keepdims=True))
    var = jnp.maximum(m2_tot / float(m), 0.0)    # biased variance (BN training)

    gamma_p = jnp.pad(gamma.astype(jnp.float32), (0, cout_p - cout))[None, :]
    beta_p = jnp.pad(beta.astype(jnp.float32), (0, cout_p - cout))[None, :]
    scale = gamma_p * lax.rsqrt(var + eps)
    bias = beta_p - mean * scale

    # ---- pass 2: normalize + activate, fully parallel over row tiles ----
    neg_slope = 0.0 if act == "relu" else 0.2
    kernel2 = functools.partial(_bn_act_kernel, neg_slope=neg_slope)
    out_flat = pl.pallas_call(
        kernel2,
        out_shape=jax.ShapeDtypeStruct((m_p, cout_p), jnp.float32),
        grid_spec=pltpu.PrefetchScalarGridSpec(
            num_scalar_prefetch=0,
            grid=(n_tiles,),
            in_specs=[pl.BlockSpec((tm, cout_p), lambda i: (i, 0)),
                      pl.BlockSpec((1, cout_p), lambda i: (0, 0)),
                      pl.BlockSpec((1, cout_p), lambda i: (0, 0))],
            out_specs=pl.BlockSpec((tm, cout_p), lambda i: (i, 0)),
        ),
        compiler_params=pltpu.CompilerParams(
            dimension_semantics=("parallel",),
            vmem_limit_bytes=vmem_limit),
    )(y, scale, bias)

    # (M, C_out) -> (N, C_out, Ho, Wo)
    out = out_flat[:m, :cout]
    return jnp.transpose(out.reshape(n, hout, wout, cout), (0, 3, 1, 2))


def _reference(x, conv_w, gamma, beta, eps=1e-5):
    """Pure-JAX reference with the same precision (bf16 matmul, bf16-stored y)."""
    xcol, (n, hout, wout) = _im2col_k4s2_reflect(x.astype(jnp.bfloat16))
    cout, cin = conv_w.shape[0], conv_w.shape[1]
    y = jnp.dot(xcol, conv_w.reshape(cout, cin * 16).T.astype(jnp.bfloat16),
                preferred_element_type=jnp.float32)
    y = y.astype(jnp.bfloat16).astype(jnp.float32)   # kernel stores y as bf16
    mean = y.mean(axis=0, keepdims=True)
    var = ((y - mean) ** 2).mean(axis=0, keepdims=True)
    yn = (y - mean) / jnp.sqrt(var + eps) * gamma[None, :] + beta[None, :]
    yn = jnp.maximum(yn, 0.0)
    return jnp.transpose(yn.reshape(n, hout, wout, cout), (0, 3, 1, 2))


if __name__ == "__main__":
    key = jax.random.PRNGKey(0)
    k_x, k_w = jax.random.split(key)

    N, C_IN, C_OUT, H, W = 2, 4, 8, 16, 16
    x = jax.random.normal(k_x, (N, C_IN, H, W), dtype=jnp.float32)
    conv_w = 0.1 * jax.random.normal(k_w, (C_OUT, C_IN, 4, 4), dtype=jnp.float32)
    gamma = jnp.ones((C_OUT,), dtype=jnp.float32)   # BatchNorm2d default init
    beta = jnp.zeros((C_OUT,), dtype=jnp.float32)

    out = block_forward(x, conv_w, gamma, beta, act="relu")
    out = jax.block_until_ready(out)

    ref = _reference(x, conv_w, gamma, beta)
    assert out.shape == (N, C_OUT, H // 2, W // 2)
    assert jnp.allclose(out, ref, atol=4e-3, rtol=4e-3)

    print("KERNEL_OK")
</pallas_src>

<mosaic_0001>
module attributes {stable_mosaic.version = 11 : i64} {
  func.func @_conv_stats_kernel(%arg0: i32, %arg1: memref<128x128xbf16, #tpu.memory_space<vmem>>, %arg2: memref<128x128xbf16, #tpu.memory_space<vmem>>, %arg3: memref<128x128xbf16, #tpu.memory_space<vmem>>, %arg4: memref<1x8x128xf32, #tpu.memory_space<vmem>>, %arg5: memref<1x8x128xf32, #tpu.memory_space<vmem>>) attributes {dimension_semantics = [#tpu.dimension_semantics<parallel>], iteration_bounds = array<i64: 1>, scalar_prefetch = 0 : i64, scratch_operands = 0 : i64, tpu.core_type = #tpu.core_type<tc>, window_params = [{transform_indices = @transform_0, window_bounds = array<i64: 128, 128>}, {pipeline_mode = #tpu.pipeline_mode<synchronous>, transform_indices = @transform_1, window_bounds = array<i64: 128, 128>}, {transform_indices = @transform_2, window_bounds = array<i64: 128, 128>}, {transform_indices = @transform_3, window_bounds = array<i64: 1, 8, 128>}, {transform_indices = @transform_4, window_bounds = array<i64: 1, 8, 128>}]} {
    %c0 = arith.constant 0 : index
    %c0_0 = arith.constant 0 : index
    %0 = vector.load %arg1[%c0, %c0_0] : memref<128x128xbf16, #tpu.memory_space<vmem>>, vector<128x128xbf16>
    %c0_1 = arith.constant 0 : index
    %c0_2 = arith.constant 0 : index
    %1 = vector.load %arg2[%c0_1, %c0_2] : memref<128x128xbf16, #tpu.memory_space<vmem>>, vector<128x128xbf16>
    %cst = arith.constant dense<0.000000e+00> : vector<128x128xf32>
    %2 = tpu.matmul %0, %1, %cst {dimension_numbers = #tpu.dot_dimension_numbers<[1], [0], [0], [1], [0, 0, 1, 1], [], []>} : vector<128x128xbf16>, vector<128x128xbf16>, vector<128x128xf32> -> vector<128x128xf32>
    %3 = arith.truncf %2 : vector<128x128xf32> to vector<128x128xbf16>
    %c0_3 = arith.constant 0 : index
    %c0_4 = arith.constant 0 : index
    %4 = vector.load %arg3[%c0_3, %c0_4] : memref<128x128xbf16, #tpu.memory_space<vmem>>, vector<128x128xbf16>
    tpu.vector_store %arg3[%c0_3, %c0_4], %3 {strides = array<i32>} : memref<128x128xbf16, #tpu.memory_space<vmem>>, vector<128x128xbf16>,
    %5 = arith.extf %3 : vector<128x128xbf16> to vector<128x128xf32>
    %cst_5 = arith.constant dense<0.000000e+00> : vector<128xf32>
    %6 = vector.multi_reduction <add>, %5, %cst_5 [0] : vector<128x128xf32> to vector<128xf32>
    %7 = vector.shape_cast %6 : vector<128xf32> to vector<1x128xf32>
    %cst_6 = arith.constant 7.812500e-03 : f32
    %8 = vector.broadcast %cst_6 : f32 to vector<1x128xf32>
    %9 = arith.mulf %7, %8 : vector<1x128xf32>
    %10 = vector.broadcast %9 : vector<1x128xf32> to vector<128x128xf32>
    %11 = arith.subf %5, %10 : vector<128x128xf32>
    %12 = arith.mulf %11, %11 : vector<128x128xf32>
    %cst_7 = arith.constant dense<0.000000e+00> : vector<128xf32>
    %13 = vector.multi_reduction <add>, %12, %cst_7 [0] : vector<128x128xf32> to vector<128xf32>
    %14 = vector.shape_cast %13 : vector<128xf32> to vector<1x128xf32>
    %15 = vector.shape_cast %7 : vector<1x128xf32> to vector<1x128xf32>
    %16 = vector.broadcast %15 : vector<1x128xf32> to vector<8x128xf32>
    %c0_8 = arith.constant 0 : index
    %c0_9 = arith.constant 0 : index
    %c0_10 = arith.constant 0 : index
    %17 = vector.load %arg4[%c0_8, %c0_9, %c0_10] : memref<1x8x128xf32, #tpu.memory_space<vmem>>, vector<1x8x128xf32>
    %18 = vector.shape_cast %17 : vector<1x8x128xf32> to vector<8x128xf32>
    %19 = vector.shape_cast %16 : vector<8x128xf32> to vector<1x8x128xf32>
    tpu.vector_store %arg4[%c0_8, %c0_9, %c0_10], %19 {strides = array<i32>} : memref<1x8x128xf32, #tpu.memory_space<vmem>>, vector<1x8x128xf32>,
    %20 = vector.shape_cast %14 : vector<1x128xf32> to vector<1x128xf32>
    %21 = vector.broadcast %20 : vector<1x128xf32> to vector<8x128xf32>
    %c0_11 = arith.constant 0 : index
    %c0_12 = arith.constant 0 : index
    %c0_13 = arith.constant 0 : index
    %22 = vector.load %arg5[%c0_11, %c0_12, %c0_13] : memref<1x8x128xf32, #tpu.memory_space<vmem>>, vector<1x8x128xf32>
    %23 = vector.shape_cast %22 : vector<1x8x128xf32> to vector<8x128xf32>
    %24 = vector.shape_cast %21 : vector<8x128xf32> to vector<1x8x128xf32>
    tpu.vector_store %arg5[%c0_11, %c0_12, %c0_13], %24 {strides = array<i32>} : memref<1x8x128xf32, #tpu.memory_space<vmem>>, vector<1x8x128xf32>,
    return
  }
  func.func @transform_0(%arg0: i32) -> (i32, i32) {
    %c0_i32 = arith.constant 0 : i32
    %c0_i32_0 = arith.constant 0 : i32
    return %arg0, %c0_i32 : i32, i32
  }
  func.func @transform_1(%arg0: i32) -> (i32, i32) {
    %c0_i32 = arith.constant 0 : i32
    %c0_i32_0 = arith.constant 0 : i32
    %c0_i32_1 = arith.constant 0 : i32
    return %c0_i32, %c0_i32_0 : i32, i32
  }
  func.func @transform_2(%arg0: i32) -> (i32, i32) {
    %c0_i32 = arith.constant 0 : i32
    %c0_i32_0 = arith.constant 0 : i32
    return %arg0, %c0_i32 : i32, i32
  }
  func.func @transform_3(%arg0: i32) -> (i32, i32, i32) {
    %c0_i32 = arith.constant 0 : i32
    %c0_i32_0 = arith.constant 0 : i32
    %c0_i32_1 = arith.constant 0 : i32
    return %arg0, %c0_i32, %c0_i32_0 : i32, i32, i32
  }
  func.func @transform_4(%arg0: i32) -> (i32, i32, i32) {
    %c0_i32 = arith.constant 0 : i32
    %c0_i32_0 = arith.constant 0 : i32
    %c0_i32_1 = arith.constant 0 : i32
    return %arg0, %c0_i32, %c0_i32_0 : i32, i32, i32
  }
}

module attributes {stable_mosaic.version = 11 : i64} {
  func.func @_bn_act_kernel(%arg0: i32, %arg1: memref<128x128xbf16, #tpu.memory_space<vmem>>, %arg2: memref<1x128xf32, #tpu.memory_space<vmem>>, %arg3: memref<1x128xf32, #tpu.memory_space<vmem>>, %arg4: memref<128x128xf32, #tpu.memory_space<vmem>>) attributes {dimension_semantics = [#tpu.dimension_semantics<parallel>], iteration_bounds = array<i64: 1>, scalar_prefetch = 0 : i64, scratch_operands = 0 : i64, tpu.core_type = #tpu.core_type<tc>, window_params = [{transform_indices = @transform_0, window_bounds = array<i64: 128, 128>}, {pipeline_mode = #tpu.pipeline_mode<synchronous>, transform_indices = @transform_1, window_bounds = array<i64: 1, 128>}, {pipeline_mode = #tpu.pipeline_mode<synchronous>, transform_indices = @transform_2, window_bounds = array<i64: 1, 128>}, {transform_indices = @transform_3, window_bounds = array<i64: 128, 128>}]} {
    %c0 = arith.constant 0 : index
    %c0_0 = arith.constant 0 : index
    %0 = vector.load %arg1[%c0, %c0_0] : memref<128x128xbf16, #tpu.memory_space<vmem>>, vector<128x128xbf16>
    %1 = arith.extf %0 : vector<128x128xbf16> to vector<128x128xf32>
    %c0_1 = arith.constant 0 : index
    %c0_2 = arith.constant 0 : index
    %2 = vector.load %arg2[%c0_1, %c0_2] : memref<1x128xf32, #tpu.memory_space<vmem>>, vector<1x128xf32>
    %3 = vector.broadcast %2 : vector<1x128xf32> to vector<128x128xf32>
    %4 = arith.mulf %1, %3 : vector<128x128xf32>
    %c0_3 = arith.constant 0 : index
    %c0_4 = arith.constant 0 : index
    %5 = vector.load %arg3[%c0_3, %c0_4] : memref<1x128xf32, #tpu.memory_space<vmem>>, vector<1x128xf32>
    %6 = vector.broadcast %5 : vector<1x128xf32> to vector<128x128xf32>
    %7 = arith.addf %4, %6 : vector<128x128xf32>
    %cst = arith.constant 0.000000e+00 : f32
    %8 = vector.broadcast %cst : f32 to vector<128x128xf32>
    %9 = arith.cmpf ogt, %7, %8 : vector<128x128xf32>
    %cst_5 = arith.constant 0.000000e+00 : f32
    %10 = vector.broadcast %cst_5 : f32 to vector<128x128xf32>
    %11 = arith.mulf %10, %7 : vector<128x128xf32>
    %12 = arith.select %9, %7, %11 : vector<128x128xi1>, vector<128x128xf32>
    %c0_6 = arith.constant 0 : index
    %c0_7 = arith.constant 0 : index
    %13 = vector.load %arg4[%c0_6, %c0_7] : memref<128x128xf32, #tpu.memory_space<vmem>>, vector<128x128xf32>
    tpu.vector_store %arg4[%c0_6, %c0_7], %12 {strides = array<i32>} : memref<128x128xf32, #tpu.memory_space<vmem>>, vector<128x128xf32>,
    return
  }
  func.func @transform_0(%arg0: i32) -> (i32, i32) {
    %c0_i32 = arith.constant 0 : i32
    %c0_i32_0 = arith.constant 0 : i32
    return %arg0, %c0_i32 : i32, i32
  }
  func.func @transform_1(%arg0: i32) -> (i32, i32) {
    %c0_i32 = arith.constant 0 : i32
    %c0_i32_0 = arith.constant 0 : i32
    %c0_i32_1 = arith.constant 0 : i32
    return %c0_i32, %c0_i32_0 : i32, i32
  }
  func.func @transform_2(%arg0: i32) -> (i32, i32) {
    %c0_i32 = arith.constant 0 : i32
    %c0_i32_0 = arith.constant 0 : i32
    %c0_i32_1 = arith.constant 0 : i32
    return %c0_i32, %c0_i32_0 : i32, i32
  }
  func.func @transform_3(%arg0: i32) -> (i32, i32) {
    %c0_i32 = arith.constant 0 : i32
    %c0_i32_0 = arith.constant 0 : i32
    return %arg0, %c0_i32 : i32, i32
  }
}

</mosaic_0001>

<bundles_post_ra>
// kernel: block_forward.2
= control target key start
LH: loop header
LB: loop body
LE: loop exit
PB: predicated region body
PF: predicated region fallthrough
CT: control target
= control target key end

     0   :  { %s599_s1 = inlined_call_operand.vmem [shape: bf16[128,128], index: 1, kind: input, shape index: {}]   ;;  %s600_s0 = inlined_call_operand.vmem [shape: bf16[128,128], index: 0, kind: input, shape index: {}]   ;;  %s601_s2 = inlined_call_operand.vmem [shape: bf16[128,128], index: 2, kind: output, shape index: {0}]   ;;  %s602_s3 = inlined_call_operand.vmem [shape: f32[1,8,128], index: 3, kind: output, shape index: {1}]   ;;  %s603_s4 = inlined_call_operand.vmem [shape: f32[1,8,128], index: 4, kind: output, shape index: {2}]  }
   0x1   :  { %v407_v0 = vld [vmem:[%s599_s1 + $0x38] sm:$0xff]  ;;  %v406_v1 = vld [vmem:[%s599_s1 + $0x30] sm:$0xff]  ;;  %v405_v2 = vld [vmem:[%s599_s1 + $0x28] sm:$0xff] }
   0x2   :  { %142 = vmatpush.bf16.msra.mxu0 %v407_v0  ;;  %455 = vmatpush.bf16.msra.mxu1 %v407_v0  ;;  %v404_v3 = vld [vmem:[%s599_s1 + $0x20] sm:$0xff]  ;;  %v403_v4 = vld [vmem:[%s599_s1 + $0x18] sm:$0xff]  ;;  %v402_v5 = vld [vmem:[%s599_s1 + $0x10] sm:$0xff] }
   0x3   :  { %456 = vmatpush.bf16.msra.mxu2 %v407_v0  ;;  %457 = vmatpush.bf16.msra.mxu3 %v407_v0  ;;  %v401_v6 = vld [vmem:[%s599_s1 + $0x8] sm:$0xff]  ;;  %v400_v7 = vld [vmem:[%s599_s1] sm:$0xff]  ;;  %v394_v9 = vld [vmem:[%s600_s0 + $0x10] sm:$0xff] }
   0x4   :  { %v392_v8 = vld [vmem:[%s600_s0] sm:$0xff]  ;;  %v398_v11 = vld [vmem:[%s600_s0 + $0x30] sm:$0xff]  ;;  %v393_v12 = vld [vmem:[%s600_s0 + $0x8] sm:$0xff] }
   0x5   :  { %v396_v10 = vld [vmem:[%s600_s0 + $0x20] sm:$0xff]  ;;  %v395_v13 = vld [vmem:[%s600_s0 + $0x18] sm:$0xff]  ;;  %v397_v14 = vld [vmem:[%s600_s0 + $0x28] sm:$0xff] }
   0x6   :  { %143 = vmatpush.bf16.msra.mxu0 %v406_v1  ;;  %458 = vmatpush.bf16.msra.mxu1 %v406_v1  ;;  %v399_v15 = vld [vmem:[%s600_s0 + $0x38] sm:$0xff] }
   0x7   :  { %459 = vmatpush.bf16.msra.mxu2 %v406_v1  ;;  %460 = vmatpush.bf16.msra.mxu3 %v406_v1 }
   0xa   :  { %144 = vmatpush.bf16.msra.mxu0 %v405_v2  ;;  %461 = vmatpush.bf16.msra.mxu1 %v405_v2 }
   0xb   :  { %462 = vmatpush.bf16.msra.mxu2 %v405_v2  ;;  %463 = vmatpush.bf16.msra.mxu3 %v405_v2 }
   0xe   :  { %145 = vmatpush.bf16.msra.mxu0 %v404_v3  ;;  %464 = vmatpush.bf16.msra.mxu1 %v404_v3 }
   0xf   :  { %465 = vmatpush.bf16.msra.mxu2 %v404_v3  ;;  %466 = vmatpush.bf16.msra.mxu3 %v404_v3 }
  0x12   :  { %146 = vmatpush.bf16.msra.mxu0 %v403_v4  ;;  %467 = vmatpush.bf16.msra.mxu1 %v403_v4 }
  0x13   :  { %468 = vmatpush.bf16.msra.mxu2 %v403_v4  ;;  %469 = vmatpush.bf16.msra.mxu3 %v403_v4 }
  0x16   :  { %147 = vmatpush.bf16.msra.mxu0 %v402_v5  ;;  %470 = vmatpush.bf16.msra.mxu1 %v402_v5 }
  0x17   :  { %471 = vmatpush.bf16.msra.mxu2 %v402_v5  ;;  %472 = vmatpush.bf16.msra.mxu3 %v402_v5 }
  0x1a   :  { %148 = vmatpush.bf16.msra.mxu0 %v401_v6  ;;  %473 = vmatpush.bf16.msra.mxu1 %v401_v6 }
  0x1b   :  { %474 = vmatpush.bf16.msra.mxu2 %v401_v6  ;;  %475 = vmatpush.bf16.msra.mxu3 %v401_v6 }
  0x1e   :  { %149 = vmatpush.bf16.msra.mxu0 %v400_v7  ;;  %476 = vmatpush.bf16.msra.mxu1 %v400_v7 }
  0x1f   :  { %477 = vmatpush.bf16.msra.mxu2 %v400_v7  ;;  %478 = vmatpush.bf16.msra.mxu3 %v400_v7 }
  0x21   :  { %150 = vmatmul.bf16.vlgmr.msra.gmra.mxu0 %v392_v8  ;;  %160 = vmatmul.bf16.vlgmr.msra.gmra.mxu1 %v394_v9 }
  0x22   :  { %170 = vmatmul.bf16.vlgmr.msra.gmra.mxu2 %v396_v10  ;;  %180 = vmatmul.bf16.vlgmr.msra.gmra.mxu3 %v398_v11 }
  0x31   :  { %155 = vmatmul.bf16.gmra.mxu0 %v393_v12  ;;  %165 = vmatmul.bf16.gmra.mxu1 %v395_v13 }
  0x32   :  { %175 = vmatmul.bf16.gmra.mxu2 %v397_v14  ;;  %185 = vmatmul.bf16.gmra.mxu3 %v399_v15 }
  0x9e   :  { %v151_v16 = vpop.f32.mrf.mxu0  ;;  %v161_v17 = vpop.f32.mrf.mxu1 }
  0x9f   :  { %v191_v31 = vpack.c.bf16 %v151_v16, %v151_v16  ;;  %v195_v38 = vpack.c.bf16 %v161_v17, %v161_v17 }
  0xa1   :  { %v569_v34 = vunpack.c.l.bf16 %v191_v31  ;;  %v227_v48 = vunpack.c.l.bf16 %v195_v38 }
  0xa5   :  { %v171_v18 = vpop.f32.mrf.mxu2  ;;  %v552_v19 = vpop.f32.mrf.mxu3 }
  0xa6   :  { %v153_v20 = vpop.f32.mrf.mxu0  ;;  %v163_v21 = vpop.f32.mrf.mxu1  ;;  %v199_v58 = vpack.c.bf16 %v171_v18, %v171_v18  ;;  %v203_v6 = vpack.c.bf16 %v552_v19, %v552_v19 }
  0xa7   :  { %v411_v22 = vpack.c.bf16 %v153_v20, %v151_v16  ;;  %v421_v23 = vpack.c.bf16 %v163_v21, %v161_v17  ;;  %v192_v30 = vpack.c.bf16 %v153_v20, %v153_v20  ;;  %v196_v45 = vpack.c.bf16 %v163_v21, %v163_v21 }
  0xa8   :  { %v231_v0 = vunpack.c.l.bf16 %v199_v58  ;;  %v235_v12 = vunpack.c.l.bf16 %v203_v6 }
  0xa9   :  { %412 = vst [vmem:[%s601_s2] sm:$0xff] %v411_v22   ;;  %v567_v33 = vunpack.c.l.bf16 %v192_v30  ;;  %v228_v51 = vunpack.c.l.bf16 %v196_v45 }
  0xaa   :  { %449 = vst [vmem:[%s601_s2 + $0x10] sm:$0xff] %v421_v23  }
  0xab   :  { %v239_v41 = vadd.f32 %v567_v33, %v569_v34 }
  0xad   :  { %v173_v24 = vpop.f32.mrf.mxu2  ;;  %v183_v25 = vpop.f32.mrf.mxu3 }
  0xae   :  { %v156_v26 = vpop.f32.mrf.mxu0  ;;  %v166_v27 = vpop.f32.mrf.mxu1  ;;  %v431_v28 = vpack.c.bf16 %v173_v24, %v171_v18  ;;  %v441_v29 = vpack.c.bf16 %v183_v25, %v552_v19  ;;  %v200_v61 = vpack.c.bf16 %v173_v24, %v173_v24  ;;  %v204_v10 = vpack.c.bf16 %v183_v25, %v183_v25 }
  0xaf   :  { %v193_v32 = vpack.c.bf16 %v156_v26, %v156_v26  ;;  %v197_v49 = vpack.c.bf16 %v166_v27, %v166_v27 }
  0xb0   :  { %451 = vst [vmem:[%s601_s2 + $0x20] sm:$0xff] %v431_v28   ;;  %v232_v3 = vunpack.c.l.bf16 %v200_v61  ;;  %v236_v15 = vunpack.c.l.bf16 %v204_v10 }
  0xb1   :  { %453 = vst [vmem:[%s601_s2 + $0x30] sm:$0xff] %v441_v29   ;;  %v571_v35 = vunpack.c.l.bf16 %v193_v32  ;;  %v229_v59 = vunpack.c.l.bf16 %v197_v49 }
  0xb3   :  { %v240_v46 = vadd.f32 %v239_v41, %v571_v35 }
  0xb5   :  { %v176_v36 = vpop.f32.mrf.mxu2  ;;  %v186_v37 = vpop.f32.mrf.mxu3 }
  0xb6   :  { %v158_v39 = vpop.f32.mrf.mxu0  ;;  %v168_v40 = vpop.f32.mrf.mxu1  ;;  %v201_v2 = vpack.c.bf16 %v176_v36, %v176_v36  ;;  %v205_v14 = vpack.c.bf16 %v186_v37, %v186_v37 }
  0xb7   :  { %v194_v42 = vpack.c.bf16 %v158_v39, %v158_v39  ;;  %v416_v43 = vpack.c.bf16 %v158_v39, %v156_v26  ;;  %v426_v44 = vpack.c.bf16 %v168_v40, %v166_v27  ;;  %v198_v53 = vpack.c.bf16 %v168_v40, %v168_v40 }
  0xb8   :  { %v233_v7 = vunpack.c.l.bf16 %v201_v2  ;;  %v237_v18 = vunpack.c.l.bf16 %v205_v14 }
  0xb9   :  { %448 = vst [vmem:[%s601_s2 + $0x8] sm:$0xff] %v416_v43   ;;  %v226_v47 = vunpack.c.l.bf16 %v194_v42  ;;  %v230_v62 = vunpack.c.l.bf16 %v198_v53 }
  0xba   :  { %450 = vst [vmem:[%s601_s2 + $0x18] sm:$0xff] %v426_v44  }
  0xbb   :  { %v241_v50 = vadd.f32 %v240_v46, %v226_v47 }
  0xbd   :  { %v242_v52 = vadd.f32 %v241_v50, %v227_v48  ;;  %v178_v54 = vpop.f32.mrf.mxu2  ;;  %v188_v55 = vpop.f32.mrf.mxu3 }
  0xbe   :  { %v436_v56 = vpack.c.bf16 %v178_v54, %v176_v36  ;;  %v446_v57 = vpack.c.bf16 %v188_v55, %v186_v37  ;;  %v202_v5 = vpack.c.bf16 %v178_v54, %v178_v54  ;;  %v206_v17 = vpack.c.bf16 %v188_v55, %v188_v55 }
  0xbf   :  { %v243_v60 = vadd.f32 %v242_v52, %v228_v51 }
  0xc0   :  { %452 = vst [vmem:[%s601_s2 + $0x28] sm:$0xff] %v436_v56   ;;  %v234_v11 = vunpack.c.l.bf16 %v202_v5  ;;  %v238_v22 = vunpack.c.l.bf16 %v206_v17 }
  0xc1   :  { %v244_v63 = vadd.f32 %v243_v60, %v229_v59  ;;  %454 = vst [vmem:[%s601_s2 + $0x38] sm:$0xff] %v446_v57  }
  0xc3   :  { %v245_v1 = vadd.f32 %v244_v63, %v230_v62 }
  0xc5   :  { %v246_v4 = vadd.f32 %v245_v1, %v231_v0 }
  0xc7   :  { %v247_v8 = vadd.f32 %v246_v4, %v232_v3 }
  0xc9   :  { %v248_v9 = vadd.f32 %v247_v8, %v233_v7 }
  0xcb   :  { %v249_v13 = vadd.f32 %v248_v9, %v234_v11 }
  0xcd   :  { %v250_v16 = vadd.f32 %v249_v13, %v235_v12 }
  0xcf   :  { %v251_v20 = vadd.f32 %v250_v16, %v236_v15 }
  0xd1   :  { %v252_v21 = vadd.f32 %v251_v20, %v237_v18 }
  0xd3   :  { %v253_v23 = vadd.f32 %v252_v21, %v238_v22 }
  0xd5   :  { %v254_v24 = vrot.slane %v253_v23, 4 }
  0xd7   :  { %v255_v26 = vadd.f32 %v254_v24, %v253_v23 }
  0xd9   :  { %v256_v27 = vrot.slane %v255_v26, 2 }
  0xdb   :  { %v257_v19 = vadd.f32 %v256_v27, %v255_v26 }
  0xdd   :  { %v258_v28 = vrot.slane %v257_v19, 1 }
  0xdf   :  { %v259_v29 = vadd.f32 %v258_v28, %v257_v19 }
  0xe1   :  { %v260_v30 = vmul.f32 0.0078125, %v259_v29  ;;  %314 = vst [vmem:[%s602_s3] sm:$0xff] %v259_v29 }
  0xe3   :  { %v261_v25 = vsub.f32 %v569_v34, %v260_v30  ;;  %v262_v31 = vsub.f32 %v567_v33, %v260_v30  ;;  %v263_v32 = vsub.f32 %v571_v35, %v260_v30  ;;  %v264_v38 = vsub.f32 %v226_v47, %v260_v30 }
  0xe4   :  { %v265_v39 = vsub.f32 %v227_v48, %v260_v30  ;;  %v266_v42 = vsub.f32 %v228_v51, %v260_v30  ;;  %v267_v45 = vsub.f32 %v229_v59, %v260_v30  ;;  %v268_v50 = vsub.f32 %v230_v62, %v260_v30 }
  0xe5   :  { %v277_v36 = vmul.f32 %v261_v25, %v261_v25  ;;  %v278_v37 = vmul.f32 %v262_v31, %v262_v31  ;;  %v279_v40 = vmul.f32 %v263_v32, %v263_v32  ;;  %v280_v43 = vmul.f32 %v264_v38, %v264_v38 }
  0xe6   :  { %v281_v46 = vmul.f32 %v265_v39, %v265_v39  ;;  %v282_v52 = vmul.f32 %v266_v42, %v266_v42  ;;  %v269_v34 = vsub.f32 %v231_v0, %v260_v30  ;;  %v283_v54 = vmul.f32 %v267_v45, %v267_v45 }
  0xe7   :  { %v293_v41 = vadd.f32 %v278_v37, %v277_v36  ;;  %v270_v55 = vsub.f32 %v232_v3, %v260_v30  ;;  %v284_v35 = vmul.f32 %v268_v50, %v268_v50  ;;  %v271_v57 = vsub.f32 %v233_v7, %v260_v30 }
  0xe8   :  { %v285_v47 = vmul.f32 %v269_v34, %v269_v34  ;;  %v272_v58 = vsub.f32 %v234_v11, %v260_v30  ;;  %v273_v61 = vsub.f32 %v235_v12, %v260_v30  ;;  %v274_v1 = vsub.f32 %v236_v15, %v260_v30 }
  0xe9   :  { %v294_v44 = vadd.f32 %v293_v41, %v279_v40  ;;  %v286_v60 = vmul.f32 %v270_v55, %v270_v55  ;;  %v287_v63 = vmul.f32 %v271_v57, %v271_v57  ;;  %v275_v4 = vsub.f32 %v237_v18, %v260_v30 }
  0xea   :  { %v288_v2 = vmul.f32 %v272_v58, %v272_v58  ;;  %v289_v5 = vmul.f32 %v273_v61, %v273_v61  ;;  %v276_v6 = vsub.f32 %v238_v22, %v260_v30  ;;  %v290_v8 = vmul.f32 %v274_v1, %v274_v1 }
  0xeb   :  { %v295_v49 = vadd.f32 %v294_v44, %v280_v43  ;;  %v291_v9 = vmul.f32 %v275_v4, %v275_v4 }
  0xec   :  { %v292_v7 = vmul.f32 %v276_v6, %v276_v6 }
  0xed   :  { %v296_v53 = vadd.f32 %v295_v49, %v281_v46 }
  0xef   :  { %v297_v33 = vadd.f32 %v296_v53, %v282_v52 }
  0xf1   :  { %v298_v56 = vadd.f32 %v297_v33, %v283_v54 }
  0xf3   :  { %v299_v48 = vadd.f32 %v298_v56, %v284_v35 }
  0xf5   :  { %v300_v51 = vadd.f32 %v299_v48, %v285_v47 }
  0xf7   :  { %v301_v59 = vadd.f32 %v300_v51, %v286_v60 }
  0xf9   :  { %v302_v62 = vadd.f32 %v301_v59, %v287_v63 }
  0xfb   :  { %v303_v0 = vadd.f32 %v302_v62, %v288_v2 }
  0xfd   :  { %v304_v3 = vadd.f32 %v303_v0, %v289_v5 }
  0xff   :  { %v305_v10 = vadd.f32 %v304_v3, %v290_v8 }
 0x101   :  { %v306_v13 = vadd.f32 %v305_v10, %v291_v9 }
 0x103   :  { %v307_v14 = vadd.f32 %v306_v13, %v292_v7 }
 0x105   :  { %v308_v11 = vrot.slane %v307_v14, 4 }
 0x107   :  { %v309_v16 = vadd.f32 %v308_v11, %v307_v14 }
 0x109   :  { %v310_v17 = vrot.slane %v309_v16, 2 }
 0x10b   :  { %v311_v12 = vadd.f32 %v310_v17, %v309_v16 }
 0x10d   :  { %v312_v20 = vrot.slane %v311_v12, 1 }
 0x10f   :  { %v313_v21 = vadd.f32 %v312_v20, %v311_v12 }
 0x111   :  { %315 = vst [vmem:[%s603_s4] sm:$0xff] %v313_v21 }

// kernel: block_forward.3
= control target key start
LH: loop header
LB: loop body
LE: loop exit
PB: predicated region body
PF: predicated region fallthrough
CT: control target
= control target key end

     0   :  { %s329_s0 = inlined_call_operand.vmem [shape: bf16[128,128], index: 0, kind: input, shape index: {}]   ;;  %s330_s1 = inlined_call_operand.vmem [shape: f32[1,128], index: 1, kind: input, shape index: {}]   ;;  %s331_s2 = inlined_call_operand.vmem [shape: f32[1,128], index: 2, kind: input, shape index: {}]   ;;  %s332_s3 = inlined_call_operand.vmem [shape: f32[128,128], index: 3, kind: output, shape index: {}]  }
   0x1   :  { %v155_v0 = vld [vmem:[%s329_s0] sm:$0xff]   ;;  %v186_v5 = vld [vmem:[%s329_s0 + $0x8] sm:$0xff]   ;;  %v187_v8 = vld [vmem:[%s329_s0 + $0x10] sm:$0xff]  }
   0x2   :  { %v221_v1 = vld [vmem:[%s330_s1] ss:$0 sm:$0xff]  ;;  %v156_v2 = vunpack.c.l.bf16 %v155_v0  ;;  %v157_v4 = vunpack.c.h.bf16 %v155_v0  ;;  %v160_v6 = vunpack.c.l.bf16 %v186_v5  ;;  %v161_v7 = vunpack.c.h.bf16 %v186_v5  ;;  %v188_v9 = vld [vmem:[%s329_s0 + $0x18] sm:$0xff]   ;;  %v190_v41 = vld [vmem:[%s329_s0 + $0x28] sm:$0xff]  }
   0x3   :  { %v226_v3 = vld [vmem:[%s331_s2] ss:$0 sm:$0xff]  ;;  %v164_v12 = vunpack.c.l.bf16 %v187_v8  ;;  %v165_v13 = vunpack.c.h.bf16 %v187_v8  ;;  %v168_v16 = vunpack.c.l.bf16 %v188_v9  ;;  %v169_v17 = vunpack.c.h.bf16 %v188_v9  ;;  %v191_v44 = vld [vmem:[%s329_s0 + $0x30] sm:$0xff]   ;;  %v192_v49 = vld [vmem:[%s329_s0 + $0x38] sm:$0xff]  }
   0x4   :  { %v50_v10 = vmul.f32 %v221_v1, %v156_v2  ;;  %v51_v11 = vmul.f32 %v221_v1, %v157_v4  ;;  %v52_v14 = vmul.f32 %v221_v1, %v160_v6  ;;  %v53_v15 = vmul.f32 %v221_v1, %v161_v7  ;;  %v189_v38 = vld [vmem:[%s329_s0 + $0x20] sm:$0xff]  }
   0x5   :  { %v54_v20 = vmul.f32 %v221_v1, %v164_v12  ;;  %v55_v21 = vmul.f32 %v221_v1, %v165_v13  ;;  %v56_v24 = vmul.f32 %v221_v1, %v168_v16  ;;  %v57_v25 = vmul.f32 %v221_v1, %v169_v17 }
   0x6   :  { %v70_v18 = vadd.f32 %v226_v3, %v50_v10  ;;  %v71_v19 = vadd.f32 %v226_v3, %v51_v11  ;;  %v72_v22 = vadd.f32 %v226_v3, %v52_v14  ;;  %v73_v23 = vadd.f32 %v226_v3, %v53_v15 }
   0x7   :  { %v74_v32 = vadd.f32 %v226_v3, %v54_v20  ;;  %v75_v33 = vadd.f32 %v226_v3, %v55_v21  ;;  %v76_v36 = vadd.f32 %v226_v3, %v56_v24  ;;  %v77_v37 = vadd.f32 %v226_v3, %v57_v25 }
   0x8   :  { %vm86_vm0 = vcmp.gt.f32.partialorder %v70_v18, 0.0  ;;  %v102_v26 = vmul.f32 0.0, %v70_v18  ;;  %vm87_vm1 = vcmp.gt.f32.partialorder %v71_v19, 0.0  ;;  %v103_v27 = vmul.f32 0.0, %v71_v19 }
   0x9   :  { %vm88_vm2 = vcmp.gt.f32.partialorder %v72_v22, 0.0  ;;  %v104_v28 = vmul.f32 0.0, %v72_v22  ;;  %vm89_vm3 = vcmp.gt.f32.partialorder %v73_v23, 0.0  ;;  %v105_v29 = vmul.f32 0.0, %v73_v23 }
   0xa   :  { %v118_v30 = vsel %vm86_vm0, %v70_v18, %v102_v26  ;;  %v119_v31 = vsel %vm87_vm1, %v71_v19, %v103_v27  ;;  %vm90_vm4 = vcmp.gt.f32.partialorder %v74_v32, 0.0  ;;  %v106_v39 = vmul.f32 0.0, %v74_v32 }
   0xb   :  { %134 = vst [vmem:[%s332_s3] sm:$0xff] %v118_v30  ;;  %v120_v34 = vsel %vm88_vm2, %v72_v22, %v104_v28  ;;  %v121_v35 = vsel %vm89_vm3, %v73_v23, %v105_v29  ;;  %vm91_vm5 = vcmp.gt.f32.partialorder %v75_v33, 0.0  ;;  %v107_v40 = vmul.f32 0.0, %v75_v33 }
   0xc   :  { %135 = vst [vmem:[%s332_s3 + $0x8] sm:$0xff] %v119_v31  ;;  %vm92_vm6 = vcmp.gt.f32.partialorder %v76_v36, 0.0  ;;  %v108_v42 = vmul.f32 0.0, %v76_v36  ;;  %vm93_vm7 = vcmp.gt.f32.partialorder %v77_v37, 0.0  ;;  %v109_v43 = vmul.f32 0.0, %v77_v37 }
   0xd   :  { %136 = vst [vmem:[%s332_s3 + $0x10] sm:$0xff] %v120_v34  ;;  %v122_v45 = vsel %vm90_vm4, %v74_v32, %v106_v39  ;;  %v123_v46 = vsel %vm91_vm5, %v75_v33, %v107_v40  ;;  %v172_v47 = vunpack.c.l.bf16 %v189_v38  ;;  %v173_v48 = vunpack.c.h.bf16 %v189_v38 }
   0xe   :  { %137 = vst [vmem:[%s332_s3 + $0x18] sm:$0xff] %v121_v35  ;;  %v124_v50 = vsel %vm92_vm6, %v76_v36, %v108_v42  ;;  %v125_v51 = vsel %vm93_vm7, %v77_v37, %v109_v43  ;;  %v176_v52 = vunpack.c.l.bf16 %v190_v41  ;;  %v177_v53 = vunpack.c.h.bf16 %v190_v41 }
   0xf   :  { %138 = vst [vmem:[%s332_s3 + $0x20] sm:$0xff] %v122_v45  ;;  %v58_v54 = vmul.f32 %v221_v1, %v172_v47  ;;  %v59_v55 = vmul.f32 %v221_v1, %v173_v48  ;;  %v180_v56 = vunpack.c.l.bf16 %v191_v44  ;;  %v181_v57 = vunpack.c.h.bf16 %v191_v44 }
  0x10   :  { %139 = vst [vmem:[%s332_s3 + $0x28] sm:$0xff] %v123_v46  ;;  %v60_v58 = vmul.f32 %v221_v1, %v176_v52  ;;  %v61_v59 = vmul.f32 %v221_v1, %v177_v53  ;;  %v184_v60 = vunpack.c.l.bf16 %v192_v49  ;;  %v185_v61 = vunpack.c.h.bf16 %v192_v49 }
  0x11   :  { %140 = vst [vmem:[%s332_s3 + $0x30] sm:$0xff] %v124_v50  ;;  %v78_v62 = vadd.f32 %v226_v3, %v58_v54  ;;  %v79_v63 = vadd.f32 %v226_v3, %v59_v55  ;;  %v62_v0 = vmul.f32 %v221_v1, %v180_v56  ;;  %v63_v2 = vmul.f32 %v221_v1, %v181_v57 }
  0x12   :  { %141 = vst [vmem:[%s332_s3 + $0x38] sm:$0xff] %v125_v51  ;;  %v80_v4 = vadd.f32 %v226_v3, %v60_v58  ;;  %v81_v5 = vadd.f32 %v226_v3, %v61_v59  ;;  %v64_v6 = vmul.f32 %v221_v1, %v184_v60  ;;  %v65_v7 = vmul.f32 %v221_v1, %v185_v61 }
  0x13   :  { %vm94_vm8 = vcmp.gt.f32.partialorder %v78_v62, 0.0  ;;  %v110_v8 = vmul.f32 0.0, %v78_v62  ;;  %vm95_vm9 = vcmp.gt.f32.partialorder %v79_v63, 0.0  ;;  %v111_v9 = vmul.f32 0.0, %v79_v63 }
  0x14   :  { %vm96_vm10 = vcmp.gt.f32.partialorder %v80_v4, 0.0  ;;  %v112_v10 = vmul.f32 0.0, %v80_v4  ;;  %vm97_vm11 = vcmp.gt.f32.partialorder %v81_v5, 0.0  ;;  %v113_v11 = vmul.f32 0.0, %v81_v5 }
  0x15   :  { %v126_v12 = vsel %vm94_vm8, %v78_v62, %v110_v8  ;;  %v127_v13 = vsel %vm95_vm9, %v79_v63, %v111_v9  ;;  %v82_v14 = vadd.f32 %v226_v3, %v62_v0  ;;  %v83_v15 = vadd.f32 %v226_v3, %v63_v2 }
  0x16   :  { %142 = vst [vmem:[%s332_s3 + $0x40] sm:$0xff] %v126_v12  ;;  %v128_v16 = vsel %vm96_vm10, %v80_v4, %v112_v10  ;;  %v129_v1 = vsel %vm97_vm11, %v81_v5, %v113_v11  ;;  %v84_v17 = vadd.f32 %v226_v3, %v64_v6  ;;  %v85_v18 = vadd.f32 %v226_v3, %v65_v7 }
  0x17   :  { %143 = vst [vmem:[%s332_s3 + $0x48] sm:$0xff] %v127_v13  ;;  %vm98_vm12 = vcmp.gt.f32.partialorder %v82_v14, 0.0  ;;  %v114_v19 = vmul.f32 0.0, %v82_v14  ;;  %vm99_vm13 = vcmp.gt.f32.partialorder %v83_v15, 0.0  ;;  %v115_v20 = vmul.f32 0.0, %v83_v15 }
  0x18   :  { %144 = vst [vmem:[%s332_s3 + $0x50] sm:$0xff] %v128_v16  ;;  %vm100_vm14 = vcmp.gt.f32.partialorder %v84_v17, 0.0  ;;  %v116_v21 = vmul.f32 0.0, %v84_v17  ;;  %vm101_vm15 = vcmp.gt.f32.partialorder %v85_v18, 0.0  ;;  %v117_v22 = vmul.f32 0.0, %v85_v18 }
  0x19   :  { %145 = vst [vmem:[%s332_s3 + $0x58] sm:$0xff] %v129_v1  ;;  %v130_v3 = vsel %vm98_vm12, %v82_v14, %v114_v19  ;;  %v131_v23 = vsel %vm99_vm13, %v83_v15, %v115_v20 }
  0x1a   :  { %146 = vst [vmem:[%s332_s3 + $0x60] sm:$0xff] %v130_v3  ;;  %v132_v24 = vsel %vm100_vm14, %v84_v17, %v116_v21  ;;  %v133_v25 = vsel %vm101_vm15, %v85_v18, %v117_v22 }
  0x1b   :  { %147 = vst [vmem:[%s332_s3 + $0x68] sm:$0xff] %v131_v23 }
  0x1c   :  { %148 = vst [vmem:[%s332_s3 + $0x70] sm:$0xff] %v132_v24 }
  0x1d   :  { %149 = vst [vmem:[%s332_s3 + $0x78] sm:$0xff] %v133_v25 }

</bundles_post_ra>
